<compile_context>
chip_gen: v5e
topology: v5e:2x2
jax: 0.10.0
libtpu: 0.0.40
codegen_flags: <defaults>
</compile_context>

<pallas_src>
import functools

import jax
import jax.numpy as jnp
from jax.experimental import pallas as pl
from jax.experimental.pallas import tpu as pltpu


_ACTIVATIONS = {
    "ReLU": lambda y: jnp.maximum(y, 0.0),
    "Tanh": jnp.tanh,
    "Sigmoid": jax.nn.sigmoid,
    "GELU": jax.nn.gelu,
    "SiLU": jax.nn.silu,
    "ELU": jax.nn.elu,
    "LeakyReLU": lambda y: jax.nn.leaky_relu(y, 0.01),
    "Softplus": jax.nn.softplus,
}


def _cnn_block_kernel(w_ref, x_ref, o_ref, *, dilations, activation):
    """Fused CnnBlock for one batch element (NCL layout, channels on sublanes).

    w_ref : (n_layers, C, 2C) stacked taps  [W[:,:,0] | W[:,:,1]]  per layer
    x_ref : (1, C, Lp) input block (Lp = L padded to a multiple of 128)
    o_ref : (1, C, Lp) output block
    """
    x0 = x_ref[0]                                   # (C, Lp)
    c, lp = x0.shape

    # Hoisted once: column (time) index used to mask the causal shift wraparound.
    col = jax.lax.broadcasted_iota(jnp.int32, (c, lp), 1)

    h = x0
    for i, d in enumerate(dilations):
        # h_shift[:, t] = h[:, t - d] for t >= d, else 0 (== zero padding of size d).
        h_shift = jnp.where(col >= d, pltpu.roll(h, shift=d, axis=1), 0.0)
        # Both conv taps as a single MXU matmul with contraction depth 2C.
        h_cat = jnp.concatenate([h_shift, h], axis=0)          # (2C, Lp)
        y = jnp.dot(w_ref[i], h_cat, preferred_element_type=jnp.float32)
        h = activation(y)

    # Block residual (net(x) + x), lane-dense store.
    o_ref[0] = (h + x0).astype(o_ref.dtype)


def cnn_block_forward(x_ncl, weights, activate_func="ReLU"):
    """Pallas implementation of CnnBlock.forward.

    x_ncl   : (B, C, L) float32  (PyTorch NCL layout)
    weights : list of (C_out, C_in, 3) conv weights (tap 2 is masked to zero)
    """
    if activate_func not in _ACTIVATIONS:
        raise ValueError(
            f"Unsupported activate_func {activate_func!r}; "
            f"supported: {sorted(_ACTIVATIONS)}")
    activation = _ACTIVATIONS[activate_func]

    B, C, L = x_ncl.shape
    n_layers = len(weights)
    dilations = tuple(2 ** i for i in range(n_layers))

    # Stack both (unmasked) taps of every layer: (n_layers, C, 2C).
    # TODO(synk): cast weights/activations to bf16 (f32 accumulation) for real,
    # accuracy-tolerant configs; kept f32 here for the strict correctness check.
    w_stacked = jnp.stack(
        [jnp.concatenate([w[:, :, 0], w[:, :, 1]], axis=1) for w in weights],
        axis=0,
    ).astype(x_ncl.dtype)

    # Pad L (the lane axis) to a multiple of 128: lane-dense stores + aligned rolls.
    Lp = 128 * pl.cdiv(L, 128)
    x_pad = jnp.pad(x_ncl, ((0, 0), (0, 0), (0, Lp - L))) if Lp != L else x_ncl

    kernel = functools.partial(
        _cnn_block_kernel, dilations=dilations, activation=activation)

    out = pl.pallas_call(
        kernel,
        out_shape=jax.ShapeDtypeStruct((B, C, Lp), x_ncl.dtype),
        grid=(B,),
        in_specs=[
            # Weights: full array, constant index_map -> fetched into VMEM once.
            pl.BlockSpec((n_layers, C, 2 * C), lambda b: (0, 0, 0)),
            # Per-batch activation slab (also serves as the residual input).
            pl.BlockSpec((1, C, Lp), lambda b: (b, 0, 0)),
        ],
        out_specs=pl.BlockSpec((1, C, Lp), lambda b: (b, 0, 0)),
        compiler_params=pltpu.CompilerParams(
            dimension_semantics=("parallel",)),
    )(w_stacked, x_pad)

    return out[:, :, :L] if Lp != L else out


def cnn_block_reference(x_ncl, weights, activate_func="ReLU"):
    """Pure-JAX reference matching the PyTorch module (for correctness check)."""
    activation = _ACTIVATIONS[activate_func]
    h = x_ncl
    for i, w in enumerate(weights):
        d = 2 ** i
        w_masked = w.at[:, :, 2].set(0.0)  # MaskedCNN: mask[:, :, k//2 + 1] = 0
        h = jax.lax.conv_general_dilated(
            h, w_masked,
            window_strides=(1,),
            padding=[(d, d)],
            rhs_dilation=(d,),
            dimension_numbers=("NCH", "OIH", "NCH"),
        )
        h = activation(h)
    return h + x_ncl


if __name__ == "__main__":
    # Small, deterministic configuration.
    layer_num = 3
    hidden_dim = 32
    batch = 2
    seq_len = 16
    activate_func = "ReLU"

    key = jax.random.PRNGKey(0)
    k_x, *k_ws = jax.random.split(key, 1 + layer_num)

    # Input in PyTorch NCL layout: (B, hidden_dim, L)
    x = jax.random.normal(k_x, (batch, hidden_dim, seq_len), dtype=jnp.float32)

    # Deterministic conv weights, shaped like nn.Conv1d: (C_out, C_in, kernel_size=3).
    bound = 1.0 / jnp.sqrt(hidden_dim * 3.0)
    weights = [
        jax.random.uniform(k, (hidden_dim, hidden_dim, 3),
                           dtype=jnp.float32, minval=-bound, maxval=bound)
        for k in k_ws
    ]

    out = cnn_block_forward(x, weights, activate_func)
    out = jax.block_until_ready(out)

    ref = cnn_block_reference(x, weights, activate_func)
    assert out.shape == x.shape == ref.shape
    assert jnp.allclose(out, ref, atol=1e-5, rtol=1e-5), (
        "Pallas output does not match reference")

    print("KERNEL_OK")
</pallas_src>

<mosaic_0001>
module attributes {stable_mosaic.version = 11 : i64} {
  func.func @_cnn_block_kernel(%arg0: i32, %arg1: memref<3x32x64xf32, #tpu.memory_space<vmem>>, %arg2: memref<1x32x128xf32, #tpu.memory_space<vmem>>, %arg3: memref<1x32x128xf32, #tpu.memory_space<vmem>>) attributes {dimension_semantics = [#tpu.dimension_semantics<parallel>], iteration_bounds = array<i64: 2>, scalar_prefetch = 0 : i64, scratch_operands = 0 : i64, tpu.core_type = #tpu.core_type<tc>, window_params = [{pipeline_mode = #tpu.pipeline_mode<synchronous>, transform_indices = @transform_0, window_bounds = array<i64: 3, 32, 64>}, {transform_indices = @transform_1, window_bounds = array<i64: 1, 32, 128>}, {transform_indices = @transform_2, window_bounds = array<i64: 1, 32, 128>}]} {
    %c0 = arith.constant 0 : index
    %c0_0 = arith.constant 0 : index
    %c0_1 = arith.constant 0 : index
    %0 = vector.load %arg2[%c0, %c0_0, %c0_1] : memref<1x32x128xf32, #tpu.memory_space<vmem>>, vector<1x32x128xf32>
    %1 = vector.shape_cast %0 : vector<1x32x128xf32> to vector<32x128xf32>
    %2 = tpu.iota {dimensions = array<i32: 1>} : vector<32x128xi32>
    %c1_i32 = arith.constant 1 : i32
    %3 = vector.broadcast %c1_i32 : i32 to vector<32x128xi32>
    %4 = arith.cmpi sge, %2, %3 : vector<32x128xi32>
    %c1_i32_2 = arith.constant 1 : i32
    %5 = tpu.dynamic_rotate %1 by %c1_i32_2 dim 1 : vector<32x128xf32>, i32 -> vector<32x128xf32>
    %cst = arith.constant 0.000000e+00 : f32
    %6 = vector.broadcast %cst : f32 to vector<32x128xf32>
    %7 = arith.select %4, %5, %6 : vector<32x128xi1>, vector<32x128xf32>
    %8 = tpu.concatenate %7, %1 in 0 : vector<32x128xf32>, vector<32x128xf32> -> vector<64x128xf32>
    %c0_3 = arith.constant 0 : index
    %c0_4 = arith.constant 0 : index
    %c0_5 = arith.constant 0 : index
    %9 = vector.load %arg1[%c0_3, %c0_4, %c0_5] : memref<3x32x64xf32, #tpu.memory_space<vmem>>, vector<1x32x64xf32>
    %10 = vector.shape_cast %9 : vector<1x32x64xf32> to vector<32x64xf32>
    %cst_6 = arith.constant dense<0.000000e+00> : vector<32x128xf32>
    %11 = tpu.matmul %10, %8, %cst_6 {dimension_numbers = #tpu.dot_dimension_numbers<[1], [0], [0], [1], [0, 0, 1, 1], [], []>} : vector<32x64xf32>, vector<64x128xf32>, vector<32x128xf32> -> vector<32x128xf32>
    %cst_7 = arith.constant 0.000000e+00 : f32
    %12 = vector.broadcast %cst_7 : f32 to vector<32x128xf32>
    %13 = arith.maximumf %11, %12 : vector<32x128xf32>
    %c2_i32 = arith.constant 2 : i32
    %14 = vector.broadcast %c2_i32 : i32 to vector<32x128xi32>
    %15 = arith.cmpi sge, %2, %14 : vector<32x128xi32>
    %c2_i32_8 = arith.constant 2 : i32
    %16 = tpu.dynamic_rotate %13 by %c2_i32_8 dim 1 : vector<32x128xf32>, i32 -> vector<32x128xf32>
    %cst_9 = arith.constant 0.000000e+00 : f32
    %17 = vector.broadcast %cst_9 : f32 to vector<32x128xf32>
    %18 = arith.select %15, %16, %17 : vector<32x128xi1>, vector<32x128xf32>
    %19 = tpu.concatenate %18, %13 in 0 : vector<32x128xf32>, vector<32x128xf32> -> vector<64x128xf32>
    %c1 = arith.constant 1 : index
    %c0_10 = arith.constant 0 : index
    %c0_11 = arith.constant 0 : index
    %20 = vector.load %arg1[%c1, %c0_10, %c0_11] : memref<3x32x64xf32, #tpu.memory_space<vmem>>, vector<1x32x64xf32>
    %21 = vector.shape_cast %20 : vector<1x32x64xf32> to vector<32x64xf32>
    %cst_12 = arith.constant dense<0.000000e+00> : vector<32x128xf32>
    %22 = tpu.matmul %21, %19, %cst_12 {dimension_numbers = #tpu.dot_dimension_numbers<[1], [0], [0], [1], [0, 0, 1, 1], [], []>} : vector<32x64xf32>, vector<64x128xf32>, vector<32x128xf32> -> vector<32x128xf32>
    %cst_13 = arith.constant 0.000000e+00 : f32
    %23 = vector.broadcast %cst_13 : f32 to vector<32x128xf32>
    %24 = arith.maximumf %22, %23 : vector<32x128xf32>
    %c4_i32 = arith.constant 4 : i32
    %25 = vector.broadcast %c4_i32 : i32 to vector<32x128xi32>
    %26 = arith.cmpi sge, %2, %25 : vector<32x128xi32>
    %c4_i32_14 = arith.constant 4 : i32
    %27 = tpu.dynamic_rotate %24 by %c4_i32_14 dim 1 : vector<32x128xf32>, i32 -> vector<32x128xf32>
    %cst_15 = arith.constant 0.000000e+00 : f32
    %28 = vector.broadcast %cst_15 : f32 to vector<32x128xf32>
    %29 = arith.select %26, %27, %28 : vector<32x128xi1>, vector<32x128xf32>
    %30 = tpu.concatenate %29, %24 in 0 : vector<32x128xf32>, vector<32x128xf32> -> vector<64x128xf32>
    %c2 = arith.constant 2 : index
    %c0_16 = arith.constant 0 : index
    %c0_17 = arith.constant 0 : index
    %31 = vector.load %arg1[%c2, %c0_16, %c0_17] : memref<3x32x64xf32, #tpu.memory_space<vmem>>, vector<1x32x64xf32>
    %32 = vector.shape_cast %31 : vector<1x32x64xf32> to vector<32x64xf32>
    %cst_18 = arith.constant dense<0.000000e+00> : vector<32x128xf32>
    %33 = tpu.matmul %32, %30, %cst_18 {dimension_numbers = #tpu.dot_dimension_numbers<[1], [0], [0], [1], [0, 0, 1, 1], [], []>} : vector<32x64xf32>, vector<64x128xf32>, vector<32x128xf32> -> vector<32x128xf32>
    %cst_19 = arith.constant 0.000000e+00 : f32
    %34 = vector.broadcast %cst_19 : f32 to vector<32x128xf32>
    %35 = arith.maximumf %33, %34 : vector<32x128xf32>
    %36 = arith.addf %35, %1 : vector<32x128xf32>
    %c0_20 = arith.constant 0 : index
    %c0_21 = arith.constant 0 : index
    %c0_22 = arith.constant 0 : index
    %37 = vector.load %arg3[%c0_20, %c0_21, %c0_22] : memref<1x32x128xf32, #tpu.memory_space<vmem>>, vector<1x32x128xf32>
    %38 = vector.shape_cast %37 : vector<1x32x128xf32> to vector<32x128xf32>
    %39 = vector.shape_cast %36 : vector<32x128xf32> to vector<1x32x128xf32>
    tpu.vector_store %arg3[%c0_20, %c0_21, %c0_22], %39 {strides = array<i32>} : memref<1x32x128xf32, #tpu.memory_space<vmem>>, vector<1x32x128xf32>,
    return
  }
  func.func @transform_0(%arg0: i32) -> (i32, i32, i32) {
    %c0_i32 = arith.constant 0 : i32
    %c0_i32_0 = arith.constant 0 : i32
    %c0_i32_1 = arith.constant 0 : i32
    %c0_i32_2 = arith.constant 0 : i32
    return %c0_i32, %c0_i32_0, %c0_i32_1 : i32, i32, i32
  }
  func.func @transform_1(%arg0: i32) -> (i32, i32, i32) {
    %c0_i32 = arith.constant 0 : i32
    %c0_i32_0 = arith.constant 0 : i32
    %c0_i32_1 = arith.constant 0 : i32
    return %arg0, %c0_i32, %c0_i32_0 : i32, i32, i32
  }
  func.func @transform_2(%arg0: i32) -> (i32, i32, i32) {
    %c0_i32 = arith.constant 0 : i32
    %c0_i32_0 = arith.constant 0 : i32
    %c0_i32_1 = arith.constant 0 : i32
    return %arg0, %c0_i32, %c0_i32_0 : i32, i32, i32
  }
}

</mosaic_0001>

<bundles_post_ra>
// kernel: tpu_custom_call.1
= control target key start
LH: loop header
LB: loop body
LE: loop exit
PB: predicated region body
PF: predicated region fallthrough
CT: control target
= control target key end

     0   :  { %7 = vsyncpa [#allocation3], 0  ;;  %s943_s0 = inlined_call_operand.hbm [shape: f32[3,32,64], index: 0, kind: input, shape index: {}]   ;;  %s944_s1 = inlined_call_operand.hbm [shape: f32[2,32,128], index: 1, kind: input, shape index: {}]   ;;  %s945_s2 = inlined_call_operand.hbm [shape: f32[2,32,128], index: 2, kind: output, shape index: {}]  }
   0x1   :  { %8 = vsyncpa [#allocation6], 0 }
   0x2   :  { %10 = vsyncpa [#allocation6 + $0x1], 0 }
   0x3   :  { %11 = vsyncpa [#allocation4], 0 }
   0x4   :  { %13 = vsyncpa [#allocation4 + $0x1], 0  ;;  %s754_s9 = smov 0   ;;  %s756_s10 = smov 0  }
   0x5   :  { %s758_s11 = smov 0   ;;  %s760_s12 = smov 0  }
   0x6 LB: > { %s775_s13 = sadd.s32 4294967295, %s729_s12   ;;  %s485_s14 = sadd.s32 4294967294, %s729_s12   ;;  %s729_s12 = sphi %s760_s12, %s955_s12   ;;  %s725_s11 = sphi %s758_s11, %s954_s11   ;;  %s721_s10 = sphi %s756_s10, %s953_s10   ;;  %s717_s9 = sphi %s754_s9, %s952_s9  }
   0x7   : > { %p60_p0 = scmp.ne.s32.totalorder %s721_s10, %s717_s9  ;;  %p61_p1 = scmp.eq.s32.totalorder %s775_s13, 0 }
   0x8   : > { %p84_p2 = scmp.eq.s32.totalorder %s775_s13, 1  ;;  %p90_p3 = scmp.eq.s32.totalorder %s485_s14, 1 }
   0x9   : > { %p784_p4 = por %p61_p1, %p60_p0  ;;  %p486_p5 = scmp.ge.s32.totalorder %s729_s12, 1 }
   0xa   : > { %p789_p6 = por %p90_p3, %p60_p0  ;;  %p97_p7 = scmp.lt.s32.totalorder %s729_s12, 3 }
   0xb   : > { %s108_s19 = sshll.u32 %s943_s0, 4  ;;  %s731_s21 = smov [#allocation2]   ;;  %s109_s19 = int_to_ptr.hbm [resolvable:$true] %s108_s19 }
   0xc   : > { %p797_p8 = pnand %p486_p5, %p97_p7  ;;  %s110_s22 = sshll.u32 %s731_s21, 4  ;;  %s111_s22 = int_to_ptr.vmem [resolvable:$true] %s110_s22 }
   0xd   : > { %s807_s23 = sadd.s32 1, %s729_s12   ;;  %s732_s24 = smov 128  }
   0xe   : > { %p543_p9 = pneg %p797_p8  ;;  %s733_s25 = smov 8  }
   0xf   : > { %s44_s26 = ssub.s32 %s729_s12, %s807_s23  ;;  %s47_s27 = sadd.s32 1, %s725_s11 }
  0x10   : > { %p544_p10 = pnand %p543_p9, %p61_p1  ;;  %p45_p12 = scmp.eq.s32.totalorder %s44_s26, 0 }
  0x11   : > { %p54_p13 = scmp.ne.s32.totalorder %s725_s11, %s721_s10  ;;  %p55_p0 = scmp.eq.s32.totalorder %s729_s12, 0 }
  0x12   : > { %546 = dma.hbm_to_vmem [thread:$0]  (!%p544_p10), %s109_s19, 1536, %s111_s22, [#allocation3], %s732_s24, %s732_s24, %s733_s25  }
  0x13   : > { %s819_s28 = scalar_select %p45_p12, %s725_s11, %s47_s27  }
  0x14   : > { %p823_p3 = por %p84_p2, %p54_p13  ;;  %p556_p5 = scmp.lt.s32.totalorder %s729_s12, 2 }
  0x15   : > { %s124_s30 = sand.u32 1, %s725_s11   ;;  %s525_s3 = sshll.u32 %s729_s12, 5 }
  0x16   : > { %p56_p7 = por %p55_p0, %p54_p13  ;;  %s489_s4 = sshll.u32 %s124_s30, 5 }
  0x17   : > { %s133_s7 = scalar_lea.hbm %s944_s1, %s525_s3  ;;  %s128_s14 = scalar_lea.vmem [#allocation5], %s489_s4 }
  0x18   : > { %s134_s8 = sshll.u32 %s133_s7, 4  ;;  %s136_s17 = sshll.u32 %s128_s14, 4  ;;  %s135_s8 = int_to_ptr.hbm [resolvable:$true] %s134_s8  ;;  %s137_s17 = int_to_ptr.vmem [resolvable:$true] %s136_s17 }
  0x19   : > { %p833_p9 = pnand %p556_p5, %p56_p7  ;;  %s125_s19 = scalar_lea.sflag [#allocation6], %s124_s30 }
  0x1a   : > { %s629_s21 = sshra.s32 %s135_s8, 4  ;;  %s636_s3 = scalar_lea.hbm %s944_s1, 64  ;;  %s630_s21 = int_to_ptr.hbm [resolvable:$true] %s629_s21 }
  0x1b   : > { %s631_s22 = scalar_lea.hbm %s630_s21, 32  ;;  %p633_p10 = pneg %p833_p9 }
  0x1c   : > { %p632_p2 = scmp.ne.s32.totalorder %s630_s21, %s631_s22  ;;  %p637_p0 = scmp.lt.s32.totalorder %s630_s21, %s944_s1 }
  0x1d   : > { %p638_p5 = scmp.lt.s32.totalorder %s636_s3, %s631_s22 }
  0x1e   : > { %p634_p12 = pnand %p633_p10, %p632_p2 }
  0x1f   : > { %p639_p7 = por %p638_p5, %p637_p0 }
  0x20   : > { %p635_p13 = pneg %p634_p12 }
  0x22   : > { %p640_p11 = pnand %p639_p7, %p635_p13 }
  0x24   : > { %643 = shalt.err (!%p640_p11)
}
  0x25   : > { %550 = dma.hbm_to_vmem [thread:$0]  (!%p833_p9), %s135_s8, 512, %s137_s17, %s125_s19, %s732_s24, %s732_s24, %s733_s25  }
  0x26   : > { %148 = sbr.rel (%p797_p8) target bundleno = 859 (0x35b), region = 28 }
  0x2b   : > { %704 = dma.done.wait (%p61_p1), [#allocation3], 1536  }
  0x2c   : > { %706 = vsyncadd (%p61_p1), [#allocation3], 4294965760  ;;  %s857_s30 = sand.u32 1, %s721_s10  }
  0x2d   : > { %s494_s6 = sshll.u32 %s857_s30, 5  ;;  %s156_s7 = scalar_lea.sflag [#allocation6], %s857_s30 }
  0x2e   : > { %s159_s24 = scalar_lea.vmem [#allocation5], %s494_s6 }
  0x2f   : > { %708 = dma.done.wait (%p784_p4), %s156_s7, 512  }
  0x30   : > { %710 = vsyncadd (%p784_p4), %s156_s7, 4294966784  ;;  %v867_v0 = vld [vmem:[%s159_s24 + $0x18] sm:$0xff]  ;;  %v869_v1 = vld [vmem:[%s159_s24 + $0x8] sm:$0xff]  ;;  %s734_s20 = smov 1   ;;  %v185_v4 = vlaneseq  ;;  %vm204_vm1 = vcmask 523264   ;;  %s735_s15 = smov 2  }
  0x31   : > { %194 = vrot.lane.b32.xlu0 %v867_v0, %s734_s20  ;;  %190 = vrot.lane.b32.xlu1 %v869_v1, %s734_s20  ;;  %v875_v2 = vld [vmem:[%s159_s24 + $0x10] sm:$0xff]  ;;  %v879_v3 = vld [vmem:[%s159_s24] sm:$0xff]  ;;  %v201_v10 = vld [vmem:[#allocation2 + $0x8] sm:$0xff]  ;;  %s736_s25 = smov 4   ;;  %s180_s8 = scalar_lea.vmem [#allocation7], %s494_s6 }
  0x32   : > { %225 = vmatpush.msra.mxu0 %v867_v0  ;;  %527 = vmatpush.msra.mxu3 %v867_v0  ;;  %v887_v5 = vand.u32 127, %v185_v4  ;;  %v200_v11 = vld [vmem:[#allocation2] sm:$0xff]  ;;  %v202_v12 = vld [vmem:[#allocation2 + $0x10] sm:$0xff]  ;;  %v203_v13 = vld [vmem:[#allocation2 + $0x18] sm:$0xff]  ;;  %s526_s14 = sshll.u32 %s775_s13, 5  ;;  %s397_s21 = sshll.u32 %s180_s8, 4  ;;  %s398_s21 = int_to_ptr.vmem [resolvable:$true] %s397_s21 }
  0x33   : > { %v264_v26 = vld [vmem:[#allocation2 + $0x20] sm:$0xff]  ;;  %v265_v27 = vld [vmem:[#allocation2 + $0x28] sm:$0xff]  ;;  %v266_v28 = vld [vmem:[#allocation2 + $0x30] sm:$0xff]  ;;  %s396_s19 = scalar_lea.hbm %s945_s2, %s526_s14  ;;  %s385_s26 = scalar_lea.sflag [#allocation4], %s857_s30 }
  0x34   : > { %226 = vmatpush.msra.mxu0 %v875_v2  ;;  %528 = vmatpush.msra.mxu3 %v875_v2  ;;  %vm187_vm0 = vcmp.ge.s32.totalorder %v887_v5, 1  ;;  %vm250_vm2 = vcmp.ge.s32.totalorder %v887_v5, 2  ;;  %v267_v29 = vld [vmem:[#allocation2 + $0x38] sm:$0xff]  ;;  %vm313_vm3 = vcmp.ge.s32.totalorder %v887_v5, 4  ;;  %v327_v41 = vld [vmem:[#allocation2 + $0x40] sm:$0xff]  ;;  %v328_v43 = vld [vmem:[#allocation2 + $0x48] sm:$0xff] }
  0x35   : > { %v329_v44 = vld [vmem:[#allocation2 + $0x50] sm:$0xff]  ;;  %v330_v45 = vld [vmem:[#allocation2 + $0x58] sm:$0xff]  ;;  %s399_s22 = sshll.u32 %s396_s19, 4  ;;  %s679_s5 = scalar_lea.hbm %s945_s2, 64  ;;  %s400_s22 = int_to_ptr.hbm [resolvable:$true] %s399_s22 }
  0x36   : > { %227 = vmatpush.msra.mxu0 %v869_v1  ;;  %529 = vmatpush.msra.mxu3 %v869_v1  ;;  %s673_s27 = sshra.s32 %s400_s22, 4  ;;  %s674_s27 = int_to_ptr.hbm [resolvable:$true] %s673_s27 }
  0x37   : > { %s675_s13 = scalar_lea.hbm %s674_s27, 32  ;;  %p680_p11 = scmp.lt.s32.totalorder %s674_s27, %s945_s2 }
  0x38   : > { %228 = vmatpush.msra.mxu0 %v879_v3  ;;  %530 = vmatpush.msra.mxu3 %v879_v3  ;;  %p676_p1 = scmp.ne.s32.totalorder %s674_s27, %s675_s13  ;;  %p681_p9 = scmp.lt.s32.totalorder %s679_s5, %s675_s13 }
  0x39   : > { %192 = vrot.lane.b32.xlu0 %v875_v2, %s734_s20  ;;  %188 = vrot.lane.b32.xlu1 %v879_v3, %s734_s20 }
  0x3a   : > { %p677_p4 = pnand %p676_p1, %p823_p3  ;;  %p682_p2 = por %p681_p9, %p680_p11 }
  0x3c   : > { %p678_p8 = pneg %p677_p4 }
  0x3e   : > { %p683_p10 = pnand %p682_p2, %p678_p8 }
  0xa3   : > { %v195_v6 = vpop.permute.xlu0 %194  ;;  %v191_v7 = vpop.permute.xlu1 %190 }
  0xa4   : > { %496 = vmatpush.msk.msra.mxu0 %vm187_vm0, %v195_v6  ;;  %531 = vmatpush.msk.msra.mxu3 %vm187_vm0, %v195_v6 }
  0xab   : > { %v193_v8 = vpop.permute.xlu0 %192  ;;  %v189_v9 = vpop.permute.xlu1 %188 }
  0xac   : > { %497 = vmatpush.msk.msra.mxu0 %vm187_vm0, %v193_v8  ;;  %532 = vmatpush.msk.msra.mxu3 %vm187_vm0, %v193_v8 }
  0xae   : > { %498 = vmatpush.msk.msra.mxu0 %vm187_vm0, %v191_v7  ;;  %533 = vmatpush.msk.msra.mxu3 %vm187_vm0, %v191_v7 }
  0xb0   : > { %499 = vmatpush.msk.msra.mxu0 %vm187_vm0, %v189_v9  ;;  %534 = vmatpush.msk.msra.mxu3 %vm187_vm0, %v189_v9 }
  0xb1   : > { %501 = vmatmul.msk.f32.vlgmr.msra.gmra.mxu3 %vm204_vm1, %v201_v10  ;;  %500 = vmatmul.msk.f32.vlgmr.msra.gmra.mxu0 %vm204_vm1, %v200_v11 }
  0xb9   : > { %502 = vmatmul.msk.f32.gmra.mxu3 %vm204_vm1, %v202_v12 }
  0xc1   : > { %503 = vmatmul.msk.f32.gmra.mxu3 %vm204_vm1, %v203_v13 }
 0x12e   : > { %v234_v14 = vpop.f32.mrf.mxu0 }
 0x12f   : > { %v246_v15 = vmax.f32 %v234_v14, 0.0 }
 0x131   : > { %251 = vrot.lane.b32.xlu1 %v246_v15, %s735_s15 }
 0x134   : > { %v237_v16 = vpop.f32.mrf.mxu3 }
 0x135   : > { %v247_v17 = vmax.f32 %v237_v16, 0.0 }
 0x137   : > { %253 = vrot.lane.b32.xlu0 %v247_v17, %s735_s15 }
 0x13c   : > { %v240_v18 = vpop.f32.mrf.mxu3 }
 0x13d   : > { %v248_v21 = vmax.f32 %v240_v18, 0.0 }
 0x144   : > { %v243_v19 = vpop.f32.mrf.mxu3 }
 0x145   : > { %v249_v20 = vmax.f32 %v243_v19, 0.0 }
 0x147   : > { %257 = vrot.lane.b32.xlu2 %v249_v20, %s735_s15  ;;  %288 = vmatpush.msra.mxu1 %v249_v20 }
 0x149   : > { %289 = vmatpush.msra.mxu1 %v248_v21 }
 0x14b   : > { %290 = vmatpush.msra.mxu1 %v247_v17 }
 0x14d   : > { %291 = vmatpush.msra.mxu1 %v246_v15 }
 0x14f   : > { %255 = vrot.lane.b32.xlu2 %v248_v21, %s735_s15 }
 0x1a1   : > { %v258_v22 = vpop.permute.xlu2 %257 }
 0x1a2   : > { %504 = vmatpush.msk.msra.mxu1 %vm250_vm2, %v258_v22 }
 0x1a3   : > { %v252_v25 = vpop.permute.xlu1 %251 }
 0x1a9   : > { %v256_v23 = vpop.permute.xlu2 %255  ;;  %v254_v24 = vpop.permute.xlu0 %253 }
 0x1aa   : > { %505 = vmatpush.msk.msra.mxu1 %vm250_vm2, %v256_v23 }
 0x1ac   : > { %506 = vmatpush.msk.msra.mxu1 %vm250_vm2, %v254_v24 }
 0x1ae   : > { %507 = vmatpush.msk.msra.mxu1 %vm250_vm2, %v252_v25 }
 0x1af   : > { %508 = vmatmul.msk.f32.vlgmr.msra.gmra.mxu1 %vm204_vm1, %v264_v26 }
 0x1b7   : > { %509 = vmatmul.msk.f32.gmra.mxu1 %vm204_vm1, %v265_v27 }
 0x1bf   : > { %510 = vmatmul.msk.f32.gmra.mxu1 %vm204_vm1, %v266_v28 }
 0x1c7   : > { %511 = vmatmul.msk.f32.gmra.mxu1 %vm204_vm1, %v267_v29 }
 0x22c   : > { %v297_v30 = vpop.f32.mrf.mxu1 }
 0x22d   : > { %v309_v37 = vmax.f32 %v297_v30, 0.0 }
 0x234   : > { %v300_v31 = vpop.f32.mrf.mxu1 }
 0x235   : > { %v310_v32 = vmax.f32 %v300_v31, 0.0 }
 0x237   : > { %316 = vrot.lane.b32.xlu1 %v310_v32, %s736_s25 }
 0x23c   : > { %v303_v33 = vpop.f32.mrf.mxu1 }
 0x23d   : > { %v311_v34 = vmax.f32 %v303_v33, 0.0 }
 0x23f   : > { %318 = vrot.lane.b32.xlu0 %v311_v34, %s736_s25 }
 0x244   : > { %v306_v35 = vpop.f32.mrf.mxu1 }
 0x245   : > { %v312_v36 = vmax.f32 %v306_v35, 0.0 }
 0x247   : > { %320 = vrot.lane.b32.xlu2 %v312_v36, %s736_s25  ;;  %351 = vmatpush.msra.mxu2 %v312_v36 }
 0x249   : > { %352 = vmatpush.msra.mxu2 %v311_v34 }
 0x24b   : > { %353 = vmatpush.msra.mxu2 %v310_v32 }
 0x24d   : > { %354 = vmatpush.msra.mxu2 %v309_v37 }
 0x24f   : > { %314 = vrot.lane.b32.xlu2 %v309_v37, %s736_s25 }
 0x2a1   : > { %v321_v38 = vpop.permute.xlu2 %320 }
 0x2a2   : > { %512 = vmatpush.msk.msra.mxu2 %vm313_vm3, %v321_v38 }
 0x2a9   : > { %v317_v40 = vpop.permute.xlu1 %316  ;;  %v315_v42 = vpop.permute.xlu2 %314 }
 0x2b1   : > { %v319_v39 = vpop.permute.xlu0 %318 }
 0x2b2   : > { %513 = vmatpush.msk.msra.mxu2 %vm313_vm3, %v319_v39 }
 0x2b4   : > { %514 = vmatpush.msk.msra.mxu2 %vm313_vm3, %v317_v40 }
 0x2b6   : > { %515 = vmatpush.msk.msra.mxu2 %vm313_vm3, %v315_v42 }
 0x2b7   : > { %516 = vmatmul.msk.f32.vlgmr.msra.gmra.mxu2 %vm204_vm1, %v327_v41 }
 0x2bf   : > { %517 = vmatmul.msk.f32.gmra.mxu2 %vm204_vm1, %v328_v43 }
 0x2c7   : > { %518 = vmatmul.msk.f32.gmra.mxu2 %vm204_vm1, %v329_v44 }
 0x2cf   : > { %519 = vmatmul.msk.f32.gmra.mxu2 %vm204_vm1, %v330_v45 }
 0x33a   : > { %v360_v46 = vpop.f32.mrf.mxu2 }
 0x33b   : > { %v372_v47 = vmax.f32 %v360_v46, 0.0 }
 0x33d   : > { %v376_v48 = vadd.f32 %v372_v47, %v879_v3 }
 0x33f   : > { %380 = vst [vmem:[%s180_s8] sm:$0xff] %v376_v48 }
 0x342   : > { %v363_v49 = vpop.f32.mrf.mxu2 }
 0x343   : > { %v373_v50 = vmax.f32 %v363_v49, 0.0 }
 0x345   : > { %v377_v51 = vadd.f32 %v373_v50, %v869_v1 }
 0x347   : > { %381 = vst [vmem:[%s180_s8 + $0x8] sm:$0xff] %v377_v51 }
 0x34a   : > { %v366_v52 = vpop.f32.mrf.mxu2 }
 0x34b   : > { %v374_v53 = vmax.f32 %v366_v52, 0.0 }
 0x34d   : > { %v378_v54 = vadd.f32 %v374_v53, %v875_v2 }
 0x34f   : > { %382 = vst [vmem:[%s180_s8 + $0x10] sm:$0xff] %v378_v54 }
 0x352   : > { %v369_v55 = vpop.f32.mrf.mxu2 }
 0x353   : > { %v375_v56 = vmax.f32 %v369_v55, 0.0 }
 0x355   : > { %v379_v57 = vadd.f32 %v375_v56, %v867_v0 }
 0x357   : > { %383 = vst [vmem:[%s180_s8 + $0x18] sm:$0xff] %v379_v57 }
 0x358   : > { %686 = shalt.err (!%p683_p10)
}
 0x359   : > { %s737_s30 = smov 128   ;;  %s738_s24 = smov 8  }
 0x35a   : > { %541 = dma.vmem_to_hbm [thread:$0]  (%p823_p3), %s398_s21, 512, %s400_s22, %s385_s26, %s737_s30, %s737_s30, %s738_s24  }
 0x35b PF: > { %s414_s20 = sand.u32 1, %s717_s9   ;;  %p951_p12 = scmp.ge.s32.totalorder %s729_s12, 2 }
 0x35c   : > { %s415_s15 = scalar_lea.sflag [#allocation4], %s414_s20 }
 0x35d   : > { %p552_p13 = pnand %p951_p12, %p789_p6 }
 0x35f   : > { %p553_p0 = pneg %p552_p13 }
 0x361   : > { %712 = dma.done.wait (%p553_p0), %s415_s15, 512  }
 0x362   : > { %714 = vsyncadd (%p553_p0), %s415_s15, 4294966784  ;;  %p16_p5 = scmp.ge.s32.totalorder %s807_s23, 4   ;;  %s952_s9 = smov %s721_s10 }
 0x363   : > { %s953_s10 = smov %s725_s11  ;;  %s954_s11 = smov %s819_s28 }
 0x364   : > { %s955_s12 = smov %s807_s23  ;;  %18 = sbr.rel (!%p16_p5) target bundleno = 6 (0x6), region = 80 }
 0x369   :  { %421 = vsyncpa [#allocation3], 1 }
 0x36a   :  { %423 = vsyncpa [#allocation3 + $0x1], 1 }
 0x36b   :  { %424 = vsyncpa [#allocation6], 1 }
 0x36c   :  { %426 = vsyncpa [#allocation6 + $0x1], 1 }
 0x36d   :  { %427 = vsyncpa [#allocation4], 1 }
 0x36e   :  { %429 = vsyncpa [#allocation4 + $0x1], 1 }

</bundles_post_ra>
